<compile_context>
chip_gen: v7x
topology: tpu7x:2x2x1
jax: 0.10.0
libtpu: 0.0.40
codegen_flags: <defaults>
</compile_context>

<pallas_src>
import jax
import jax.numpy as jnp
from jax.experimental import pallas as pl
from jax.experimental.pallas import tpu as pltpu


def _augment_kernel(factor_ref, img_ref, lbl_ref, img_out_ref, lbl_out_ref):
    """One grid step = one (TR, L) row chunk of the flattened payload.
    Reads each input tile once; writes both concat halves (copy + scaled)."""
    f = factor_ref[0]                         # f32 scalar intensity factor (SMEM)
    x = img_ref[...]                          # (TR, L)
    y = lbl_ref[...]                          # (TR, L)

    # First half of the concat: straight copy.
    img_out_ref[0] = x
    lbl_out_ref[0] = y
    # Second half: scaled copy (compute in f32, store back in the output dtype).
    img_out_ref[1] = (x.astype(jnp.float32) * f).astype(img_out_ref.dtype)
    lbl_out_ref[1] = (y.astype(jnp.float32) * f).astype(lbl_out_ref.dtype)


def _round_up(x, m):
    return (x + m - 1) // m * m


def _sublanes_for(itemsize):
    # Sublane packing requirement for the second-minor tile dim.
    return {4: 8, 2: 16, 1: 32}.get(itemsize, 8)


def _pick_budget_bytes():
    """Per-input-block byte budget, gated per TPU generation.

    2 MiB on v6e/v7x (24 MiB live incl. double buffering, under their 32 MiB
    scoped-VMEM default); 1 MiB elsewhere (12 MiB live, under v5e's 16 MiB
    scoped default)."""
    try:
        kind = jax.devices()[0].device_kind.lower()
    except Exception:
        return 1 << 20
    if "v6" in kind or "v7" in kind:
        return 2 << 20
    return 1 << 20


def _choose_lane_width(total, itemsize, budget_bytes):
    """Largest lane width L (multiple of 128) that divides `total`, preferring
    decompositions where total//L is a multiple of the sublane packing.
    Returns None if `total` has no multiple-of-128 divisor."""
    lane = 128
    sub = _sublanes_for(itemsize)
    cap = min(total, max(lane, budget_bytes // (sub * itemsize)))
    best = None
    for cand in range(lane, cap + 1, lane):
        if total % cand:
            continue
        rows = total // cand
        score = (rows % sub == 0, cand)
        if best is None or score > best[0]:
            best = (score, cand)
    return None if best is None else best[1]


def augmenter_forward(image, label, seed=None):
    """image, label: NCHW arrays of identical shape/dtype (B, C, H, W).

    Returns (combined_image, combined_label), each (2B, C, H, W), matching
    torch.cat((x, x * intensity_factor), dim=0).  `seed` is accepted for
    signature parity but (as in the PyTorch module) ignored -- the RNG seed is
    hard-coded to 430.
    """
    assert image.shape == label.shape, "image/label must share shape (as in the module)"
    # TODO(synk): if label has a non-float dtype, PyTorch would promote
    # label * float_factor to float; this kernel keeps a single shared dtype.
    assert image.dtype == label.dtype, "image/label must share dtype for this kernel"

    B, C, H, W = image.shape
    total = B * C * H * W
    dtype = image.dtype
    itemsize = jnp.dtype(dtype).itemsize
    sub = _sublanes_for(itemsize)
    budget_bytes = _pick_budget_bytes()

    # Deterministic "random" intensity factor in [1, 2).
    # TODO(synk): torch.manual_seed(430)+torch.rand(1) (Philox) is not
    # bit-reproducible in JAX; jax.random with the same seed value gives
    # deterministic (but not bit-identical) behavior instead.
    factor = 1.0 + jax.random.uniform(jax.random.PRNGKey(430), (1,),
                                      dtype=jnp.float32)

    # Exact lane-dense decomposition total = rows * lane (no pad) when possible.
    lane = _choose_lane_width(total, itemsize, budget_bytes)
    padded_total = total
    if lane is None:
        # Rare fallback: element count not a multiple of 128 -> minimal pad and
        # an output slice (extra HBM pass, unavoidable here).
        padded_total = _round_up(total, 128)
        lane = _choose_lane_width(padded_total, itemsize, budget_bytes)

    rows = padded_total // lane
    rows_budget = max(sub, (budget_bytes // (lane * itemsize)) // sub * sub)
    tile_rows = min(rows, rows_budget)          # multiple of `sub`, or == rows
    grid = (pl.cdiv(rows, tile_rows),)

    img_flat = image.reshape(-1)
    lbl_flat = label.reshape(-1)
    if padded_total != total:
        img_flat = jnp.pad(img_flat, (0, padded_total - total))
        lbl_flat = jnp.pad(lbl_flat, (0, padded_total - total))
    img2d = img_flat.reshape(rows, lane)
    lbl2d = lbl_flat.reshape(rows, lane)

    out_img, out_lbl = pl.pallas_call(
        _augment_kernel,
        out_shape=(jax.ShapeDtypeStruct((2, rows, lane), dtype),
                   jax.ShapeDtypeStruct((2, rows, lane), dtype)),
        grid=grid,
        in_specs=[
            # scalar intensity factor, whole (1,) array in SMEM
            pl.BlockSpec(memory_space=pltpu.MemorySpace.SMEM),
            # image / label row chunks: sublane- and lane-dense (TR, L) tiles
            pl.BlockSpec((tile_rows, lane), lambda i: (i, 0)),
            pl.BlockSpec((tile_rows, lane), lambda i: (i, 0)),
        ],
        out_specs=(
            pl.BlockSpec((2, tile_rows, lane), lambda i: (0, i, 0)),
            pl.BlockSpec((2, tile_rows, lane), lambda i: (0, i, 0)),
        ),
        # TODO(synk): on v7x, confirm "parallel" shards this axis across both
        # TensorCores; if not, switch to pltpu.CORE_PARALLEL.
        compiler_params=pltpu.CompilerParams(
            dimension_semantics=("parallel",)),
    )(factor, img2d, lbl2d)

    if padded_total != total:
        out_img = out_img.reshape(2, padded_total)[:, :total]
        out_lbl = out_lbl.reshape(2, padded_total)[:, :total]

    combined_image = out_img.reshape(2 * B, C, H, W)   # contiguous -> free
    combined_label = out_lbl.reshape(2 * B, C, H, W)
    return combined_image, combined_label


if __name__ == "__main__":
    key = jax.random.PRNGKey(0)
    k_img, k_lbl = jax.random.split(key)

    B, C, H, W = 2, 4, 16, 16
    image = jax.random.normal(k_img, (B, C, H, W), dtype=jnp.float32)
    label = jax.random.normal(k_lbl, (B, C, H, W), dtype=jnp.float32)

    combined_image, combined_label = augmenter_forward(image, label, seed=0)
    jax.block_until_ready(combined_image)
    jax.block_until_ready(combined_label)

    # Reference check (pure JAX) of the forward semantics.
    factor = (1.0 + jax.random.uniform(jax.random.PRNGKey(430), (1,),
                                       dtype=jnp.float32))[0]
    ref_img = jnp.concatenate([image, image * factor], axis=0)
    ref_lbl = jnp.concatenate([label, label * factor], axis=0)

    assert combined_image.shape == (2 * B, C, H, W)
    assert combined_label.shape == (2 * B, C, H, W)
    assert jnp.allclose(combined_image, ref_img, rtol=1e-6, atol=1e-6)
    assert jnp.allclose(combined_label, ref_lbl, rtol=1e-6, atol=1e-6)

    print("KERNEL_OK")
</pallas_src>

<mosaic_0001>
module attributes {stable_mosaic.version = 11 : i64} {
  func.func @_augment_kernel(%arg0: i32, %arg1: memref<1xf32, #tpu.memory_space<smem>>, %arg2: memref<8x256xf32, #tpu.memory_space<vmem>>, %arg3: memref<8x256xf32, #tpu.memory_space<vmem>>, %arg4: memref<2x8x256xf32, #tpu.memory_space<vmem>>, %arg5: memref<2x8x256xf32, #tpu.memory_space<vmem>>) attributes {dimension_semantics = [#tpu.dimension_semantics<parallel>], iteration_bounds = array<i64: 1>, scalar_prefetch = 0 : i64, scratch_operands = 0 : i64, tpu.core_type = #tpu.core_type<tc>, window_params = [{transform_indices = @transform_0, window_bounds = array<i64: 1>}, {transform_indices = @transform_1, window_bounds = array<i64: 8, 256>}, {transform_indices = @transform_2, window_bounds = array<i64: 8, 256>}, {transform_indices = @transform_3, window_bounds = array<i64: 2, 8, 256>}, {transform_indices = @transform_4, window_bounds = array<i64: 2, 8, 256>}]} {
    %c0 = arith.constant 0 : index
    %0 = memref.load %arg1[%c0] : memref<1xf32, #tpu.memory_space<smem>>
    %c0_0 = arith.constant 0 : index
    %c0_1 = arith.constant 0 : index
    %1 = vector.load %arg2[%c0_0, %c0_1] : memref<8x256xf32, #tpu.memory_space<vmem>>, vector<8x256xf32>
    %c0_2 = arith.constant 0 : index
    %c0_3 = arith.constant 0 : index
    %2 = vector.load %arg3[%c0_2, %c0_3] : memref<8x256xf32, #tpu.memory_space<vmem>>, vector<8x256xf32>
    %c0_4 = arith.constant 0 : index
    %c0_5 = arith.constant 0 : index
    %c0_6 = arith.constant 0 : index
    %3 = vector.load %arg4[%c0_4, %c0_5, %c0_6] : memref<2x8x256xf32, #tpu.memory_space<vmem>>, vector<1x8x256xf32>
    %4 = vector.shape_cast %3 : vector<1x8x256xf32> to vector<8x256xf32>
    %5 = vector.shape_cast %1 : vector<8x256xf32> to vector<1x8x256xf32>
    tpu.vector_store %arg4[%c0_4, %c0_5, %c0_6], %5 {strides = array<i32>} : memref<2x8x256xf32, #tpu.memory_space<vmem>>, vector<1x8x256xf32>,
    %c0_7 = arith.constant 0 : index
    %c0_8 = arith.constant 0 : index
    %c0_9 = arith.constant 0 : index
    %6 = vector.load %arg5[%c0_7, %c0_8, %c0_9] : memref<2x8x256xf32, #tpu.memory_space<vmem>>, vector<1x8x256xf32>
    %7 = vector.shape_cast %6 : vector<1x8x256xf32> to vector<8x256xf32>
    %8 = vector.shape_cast %2 : vector<8x256xf32> to vector<1x8x256xf32>
    tpu.vector_store %arg5[%c0_7, %c0_8, %c0_9], %8 {strides = array<i32>} : memref<2x8x256xf32, #tpu.memory_space<vmem>>, vector<1x8x256xf32>,
    %9 = vector.broadcast %0 : f32 to vector<8x256xf32>
    %10 = arith.mulf %1, %9 : vector<8x256xf32>
    %c1 = arith.constant 1 : index
    %c0_10 = arith.constant 0 : index
    %c0_11 = arith.constant 0 : index
    %11 = vector.load %arg4[%c1, %c0_10, %c0_11] : memref<2x8x256xf32, #tpu.memory_space<vmem>>, vector<1x8x256xf32>
    %12 = vector.shape_cast %11 : vector<1x8x256xf32> to vector<8x256xf32>
    %13 = vector.shape_cast %10 : vector<8x256xf32> to vector<1x8x256xf32>
    tpu.vector_store %arg4[%c1, %c0_10, %c0_11], %13 {strides = array<i32>} : memref<2x8x256xf32, #tpu.memory_space<vmem>>, vector<1x8x256xf32>,
    %14 = vector.broadcast %0 : f32 to vector<8x256xf32>
    %15 = arith.mulf %2, %14 : vector<8x256xf32>
    %c1_12 = arith.constant 1 : index
    %c0_13 = arith.constant 0 : index
    %c0_14 = arith.constant 0 : index
    %16 = vector.load %arg5[%c1_12, %c0_13, %c0_14] : memref<2x8x256xf32, #tpu.memory_space<vmem>>, vector<1x8x256xf32>
    %17 = vector.shape_cast %16 : vector<1x8x256xf32> to vector<8x256xf32>
    %18 = vector.shape_cast %15 : vector<8x256xf32> to vector<1x8x256xf32>
    tpu.vector_store %arg5[%c1_12, %c0_13, %c0_14], %18 {strides = array<i32>} : memref<2x8x256xf32, #tpu.memory_space<vmem>>, vector<1x8x256xf32>,
    return
  }
  func.func @transform_0(%arg0: i32) -> i32 {
    %c0_i32 = arith.constant 0 : i32
    %c0_i32_0 = arith.constant 0 : i32
    return %c0_i32 : i32
  }
  func.func @transform_1(%arg0: i32) -> (i32, i32) {
    %c0_i32 = arith.constant 0 : i32
    %c0_i32_0 = arith.constant 0 : i32
    return %arg0, %c0_i32 : i32, i32
  }
  func.func @transform_2(%arg0: i32) -> (i32, i32) {
    %c0_i32 = arith.constant 0 : i32
    %c0_i32_0 = arith.constant 0 : i32
    return %arg0, %c0_i32 : i32, i32
  }
  func.func @transform_3(%arg0: i32) -> (i32, i32, i32) {
    %c0_i32 = arith.constant 0 : i32
    %c0_i32_0 = arith.constant 0 : i32
    %c0_i32_1 = arith.constant 0 : i32
    return %c0_i32, %arg0, %c0_i32_0 : i32, i32, i32
  }
  func.func @transform_4(%arg0: i32) -> (i32, i32, i32) {
    %c0_i32 = arith.constant 0 : i32
    %c0_i32_0 = arith.constant 0 : i32
    %c0_i32_1 = arith.constant 0 : i32
    return %c0_i32, %arg0, %c0_i32_0 : i32, i32, i32
  }
}

</mosaic_0001>

<bundles_post_ra>
// kernel: tpu_custom_call.1
= control target key start
LH: loop header
LB: loop body
LE: loop exit
PB: predicated region body
PF: predicated region fallthrough
CT: control target
= control target key end

     0   :  { %11 = vsyncpa [#allocation4], 0  ;;  %s288_s0 = inlined_call_operand.<no memory space> [shape: f32[1], index: 0, kind: input, shape index: {}]   ;;  %s289_s1 = inlined_call_operand.hbm [shape: f32[8,256], index: 1, kind: input, shape index: {}]   ;;  %s290_s2 = inlined_call_operand.hbm [shape: f32[8,256], index: 2, kind: input, shape index: {}]   ;;  %s291_s3 = inlined_call_operand.hbm [shape: f32[2,8,256], index: 3, kind: output, shape index: {0}]   ;;  %s292_s4 = inlined_call_operand.hbm [shape: f32[2,8,256], index: 4, kind: output, shape index: {1}]  }
   0x1   :  { %12 = vsyncpa [#allocation7], 0 }
   0x2   :  { %13 = vsyncpa [#allocation5], 0 }
   0x3   :  { %14 = vsyncpa [#allocation10], 0  ;;  %s199_s15 = smov [#allocation3]   ;;  %s200_s17 = smov [#allocation6]  }
   0x4   :  { %s23_s16 = sshll.u32 %s199_s15, 4  ;;  %s33_s18 = sshll.u32 %s200_s17, 4  ;;  %s24_s16 = int_to_ptr.vmem [resolvable:$true] %s23_s16  ;;  %s34_s18 = int_to_ptr.vmem [resolvable:$true] %s33_s18 }
   0x5   :  { %s103_s21 = scalar_lea.hbm %s289_s1, 256 }
   0x6   :  { %p104_p0 = scmp.ne.s32.totalorder %s289_s1, %s103_s21  ;;  %p107_p1 = scmp.lt.u32.totalorder %s103_s21, %s289_s1 }
   0x8   :  { %p109_p2 = pnand %p107_p1, %p104_p0 }
   0xa   :  { %112 = shalt.err (!%p109_p2)
}
   0xb   :  { %s113_s26 = scalar_lea.vmem %s24_s16, 256  ;;  %p118_p4 = scmp.lt.s32.totalorder %s24_s16, %s24_s16 }
   0xc   :  { %p114_p3 = scmp.ne.s32.totalorder %s24_s16, %s113_s26  ;;  %p119_p5 = scmp.lt.s32.totalorder %s113_s26, %s113_s26 }
   0xe   :  { %p120_p6 = por %p119_p5, %p118_p4 }
  0x10   :  { %p121_p7 = pnand %p120_p6, %p114_p3 }
  0x12   :  { %124 = shalt.err (!%p121_p7)
}
  0x13   :  { %26 = dma.hbm_to_vmem [thread:$0]  %s289_s1, 256, %s24_s16, [#allocation4]  }
  0x14   :  { %s125_s5 = scalar_lea.hbm %s290_s2, 256 }
  0x15   :  { %p126_p8 = scmp.ne.s32.totalorder %s290_s2, %s125_s5  ;;  %p129_p9 = scmp.lt.u32.totalorder %s125_s5, %s290_s2 }
  0x17   :  { %p131_p10 = pnand %p129_p9, %p126_p8 }
  0x19   :  { %134 = shalt.err (!%p131_p10)
}
  0x1a   :  { %s135_s10 = scalar_lea.vmem %s34_s18, 256  ;;  %p140_p12 = scmp.lt.s32.totalorder %s34_s18, %s34_s18 }
  0x1b   :  { %p136_p11 = scmp.ne.s32.totalorder %s34_s18, %s135_s10  ;;  %p141_p13 = scmp.lt.s32.totalorder %s135_s10, %s135_s10 }
  0x1d   :  { %p142_p0 = por %p141_p13, %p140_p12 }
  0x1f   :  { %p143_p1 = pnand %p142_p0, %p136_p11 }
  0x21   :  { %146 = shalt.err (!%p143_p1)
}
  0x22   :  { %36 = dma.hbm_to_vmem [thread:$0]  %s290_s2, 256, %s34_s18, [#allocation7]  }
  0x23   :  { %191 = dma.done.wait [#allocation4], 256  }
  0x24   :  { %192 = vsyncadd [#allocation4], 4294967040 }
  0x25   :  { %193 = dma.done.wait [#allocation7], 256  }
  0x26   :  { %194 = vsyncadd [#allocation7], 4294967040  ;;  %v52_v0 = vstv %s288_s0  ;;  %s201_s14 = smov [#allocation8]   ;;  %s202_s16 = smov [#allocation9]   ;;  %v44_v1 = vld [vmem:[#allocation3] sm:$0xff]  ;;  %v45_v2 = vld [vmem:[#allocation3 + $0x8] sm:$0xff] }
  0x27   :  { %s68_s15 = sshll.u32 %s201_s14, 4  ;;  %s80_s17 = sshll.u32 %s202_s16, 4  ;;  %v46_v3 = vld [vmem:[#allocation6] sm:$0xff]  ;;  %48 = vst [vmem:[#allocation8] sm:$0xff] %v44_v1  ;;  %49 = vst [vmem:[#allocation8 + $0x8] sm:$0xff] %v45_v2  ;;  %v47_v4 = vld [vmem:[#allocation6 + $0x8] sm:$0xff]  ;;  %v53_v5 = vmul.f32 %v52_v0, %v44_v1  ;;  %v54_v6 = vmul.f32 %v52_v0, %v45_v2  ;;  %s69_s15 = int_to_ptr.vmem [resolvable:$true] %s68_s15  ;;  %s257_s17 = int_to_ptr.vmem [resolvable:$true] %s80_s17 }
  0x28   :  { %50 = vst [vmem:[#allocation9] sm:$0xff] %v46_v3  ;;  %v58_v7 = vmul.f32 %v52_v0, %v46_v3  ;;  %51 = vst [vmem:[#allocation9 + $0x8] sm:$0xff] %v47_v4  ;;  %v59_v8 = vmul.f32 %v52_v0, %v47_v4  ;;  %s147_s0 = scalar_lea.vmem %s69_s15, 512  ;;  %p152_p3 = scmp.lt.s32.totalorder %s69_s15, %s69_s15 }
  0x29   :  { %56 = vst [vmem:[#allocation8 + $0x10] sm:$0xff] %v53_v5  ;;  %57 = vst [vmem:[#allocation8 + $0x18] sm:$0xff] %v54_v6  ;;  %p148_p2 = scmp.ne.s32.totalorder %s69_s15, %s147_s0  ;;  %p153_p4 = scmp.lt.s32.totalorder %s147_s0, %s147_s0 }
  0x2a   :  { %61 = vst [vmem:[#allocation9 + $0x10] sm:$0xff] %v58_v7  ;;  %62 = vst [vmem:[#allocation9 + $0x18] sm:$0xff] %v59_v8 }
  0x2b   :  { %p154_p5 = por %p153_p4, %p152_p3 }
  0x2d   :  { %p155_p6 = pnand %p154_p5, %p148_p2 }
  0x2f   :  { %158 = shalt.err (!%p155_p6)
}
  0x30   :  { %s159_s19 = scalar_lea.hbm %s291_s3, 512 }
  0x31   :  { %p160_p7 = scmp.ne.s32.totalorder %s291_s3, %s159_s19  ;;  %p163_p8 = scmp.lt.u32.totalorder %s159_s19, %s291_s3 }
  0x33   :  { %p165_p9 = pnand %p163_p8, %p160_p7 }
  0x35   :  { %168 = shalt.err (!%p165_p9)
}
  0x36   :  { %s203_s24 = smov 256   ;;  %s204_s25 = smov 16  }
  0x37   :  { %74 = dma.vmem_to_hbm [thread:$0]  %s69_s15, 512, %s291_s3, [#allocation5], %s203_s24, %s203_s24, %s204_s25  }
  0x38   :  { %s169_s28 = scalar_lea.vmem %s257_s17, 512  ;;  %p174_p11 = scmp.lt.s32.totalorder %s257_s17, %s257_s17 }
  0x39   :  { %p170_p10 = scmp.ne.s32.totalorder %s257_s17, %s169_s28  ;;  %p175_p12 = scmp.lt.s32.totalorder %s169_s28, %s169_s28 }
  0x3b   :  { %p176_p13 = por %p175_p12, %p174_p11 }
  0x3d   :  { %p177_p0 = pnand %p176_p13, %p170_p10 }
  0x3f   :  { %180 = shalt.err (!%p177_p0)
}
  0x40   :  { %s181_s5 = scalar_lea.hbm %s292_s4, 512 }
  0x41   :  { %p182_p1 = scmp.ne.s32.totalorder %s292_s4, %s181_s5  ;;  %p185_p2 = scmp.lt.u32.totalorder %s181_s5, %s292_s4 }
  0x43   :  { %p187_p3 = pnand %p185_p2, %p182_p1 }
  0x45   :  { %190 = shalt.err (!%p187_p3)
}
  0x46   :  { %86 = dma.vmem_to_hbm [thread:$0]  %s257_s17, 512, %s292_s4, [#allocation10], %s203_s24, %s203_s24, %s204_s25  }
  0x47   :  { %195 = dma.done.wait [#allocation5], 512  }
  0x48   :  { %196 = vsyncadd [#allocation5], 4294966784 }
  0x49   :  { %197 = dma.done.wait [#allocation10], 512  }
  0x4a   :  { %198 = vsyncadd [#allocation10], 4294966784 }
  0x4b   :  { %93 = vsyncpa [#allocation4], 1 }
  0x4c   :  { %94 = vsyncpa [#allocation7], 1 }
  0x4d   :  { %95 = vsyncpa [#allocation5], 1 }
  0x4e   :  { %96 = vsyncpa [#allocation10], 1 }

</bundles_post_ra>
